<compile_context>
chip_gen: v7x
topology: tpu7x:2x2x1
jax: 0.10.0
libtpu: 0.0.40
codegen_flags: <defaults>
</compile_context>

<pallas_src>
import numpy as np
from concurrent.futures import ThreadPoolExecutor

import jax
import jax.numpy as jnp
from jax.experimental import pallas as pl
from jax.experimental.pallas import tpu as pltpu

try:  # fast host-side assignment if scipy is present
    from scipy.optimize import linear_sum_assignment as _scipy_lsa
except Exception:  # pragma: no cover
    _scipy_lsa = None

# --- HungarianLoss hyper-parameters (module __init__ defaults) ---
COST_IOU = 2.0
COST_L1 = 5.0
COST_CAT = 1.0
LOSS_CAT = 1.0
EPS = 1e-7
LANE = 128  # TPU lane width


# ----------------------------------------------------------------------------
# Kernel 1: cost matrix (B, N, Mp), tiled over (batch, M-tile of min(Mp, 512))
# ----------------------------------------------------------------------------
def cost_kernel(pred_cat_ref, pred_box_t_ref, targ_cat_ref, targ_box_ref, out_ref):
    # block shapes: (1,TM,C) bf16, (1,4,TM) f32, (1,N,1) i32, (1,N,4) f32 -> (1,N,TM) f32
    logits = pred_cat_ref[0].astype(jnp.float32)   # (TM, C) upcast for the softmax
    pbt = pred_box_t_ref[0]                        # (4, TM) cxcywh, coords on sublanes
    tc = targ_cat_ref[0]                           # (N, 1)  int32 target classes
    tbox = targ_box_ref[0]                         # (N, 4)  cxcywh
    n = tc.shape[0]
    c = logits.shape[1]

    # one-hot + background mask built in-kernel (no HBM one-hot stream)
    onehot = (jax.lax.broadcasted_iota(jnp.int32, (n, c), 1) == tc).astype(jnp.float32)
    mask = (tc != 0).astype(jnp.float32)                             # (N, 1)

    # ---- category cost: 1 - softmax(pred_cat)[m, targ_cat[n]] ----
    z = logits - jnp.max(logits, axis=-1, keepdims=True)
    e = jnp.exp(z)
    p = e * pl.reciprocal(jnp.sum(e, axis=-1, keepdims=True), approx=True)  # (TM, C)
    # p_targ[n, m] = p[m, targ_cat[n]] via one-hot contraction over C.
    # Kept in f32 (one-hot is exact) so near-tie costs match the reference argmin.
    p_targ = jax.lax.dot_general(
        onehot, p, dimension_numbers=(((1,), (1,)), ((), ())),
        preferred_element_type=jnp.float32)                          # (N, TM)
    cat_cost = (1.0 - p_targ) * COST_CAT

    # ---- cxcywh -> xyxy ----
    pcx, pcy, pw, ph = pbt[0:1], pbt[1:2], pbt[2:3], pbt[3:4]        # (1, TM)
    px1, py1 = pcx - 0.5 * pw, pcy - 0.5 * ph
    px2, py2 = pcx + 0.5 * pw, pcy + 0.5 * ph
    tcx, tcy, tw, th = tbox[:, 0:1], tbox[:, 1:2], tbox[:, 2:3], tbox[:, 3:4]  # (N, 1)
    tx1, ty1 = tcx - 0.5 * tw, tcy - 0.5 * th
    tx2, ty2 = tcx + 0.5 * tw, tcy + 0.5 * th

    # ---- pairwise generalized IoU loss (N, TM); approx recip ok (argmin only) ----
    area_p = (px2 - px1) * (py2 - py1)                               # (1, TM)
    area_t = (tx2 - tx1) * (ty2 - ty1)                               # (N, 1)
    ix1 = jnp.maximum(tx1, px1)
    iy1 = jnp.maximum(ty1, py1)
    ix2 = jnp.minimum(tx2, px2)
    iy2 = jnp.minimum(ty2, py2)
    inter = jnp.maximum(ix2 - ix1, 0.0) * jnp.maximum(iy2 - iy1, 0.0)
    union = area_p + area_t - inter
    iou = inter * pl.reciprocal(union + EPS, approx=True)
    cx1 = jnp.minimum(tx1, px1)
    cy1 = jnp.minimum(ty1, py1)
    cx2 = jnp.maximum(tx2, px2)
    cy2 = jnp.maximum(ty2, py2)
    area_c = (cx2 - cx1) * (cy2 - cy1)
    giou = iou - (area_c - union) * pl.reciprocal(area_c + EPS, approx=True)
    loss_iou = 1.0 - giou                                            # (N, TM)

    # ---- pairwise L1 on xyxy (as in the reference), mean over 4 coords ----
    l1 = 0.25 * (jnp.abs(px1 - tx1) + jnp.abs(py1 - ty1)
                 + jnp.abs(px2 - tx2) + jnp.abs(py2 - ty2))          # (N, TM)

    out_ref[0] = cat_cost + (loss_iou * COST_IOU + l1 * COST_L1) * mask


@jax.jit
def _cost_matrix(pred_cat, pred_bbox, targ_cat, targ_bbox):
    B, M, C = pred_cat.shape
    N = targ_cat.shape[1]
    Mp = pl.cdiv(M, LANE) * LANE
    tm = min(512, Mp)                       # bigger tiles (review item 1)
    pad = Mp - M

    # cast + pad fused in this jitted wrapper: bf16 halves the dominant HBM read
    pred_cat_bf = jnp.pad(pred_cat.astype(jnp.bfloat16), ((0, 0), (0, pad), (0, 0)))
    pred_bbox_t = jnp.transpose(
        jnp.pad(pred_bbox.astype(jnp.float32), ((0, 0), (0, pad), (0, 0))), (0, 2, 1))
    targ_cat_sub = targ_cat.astype(jnp.int32)[..., None]             # (B, N, 1)
    targ_bbox_f = targ_bbox.astype(jnp.float32)                      # (B, N, 4)

    cost = pl.pallas_call(
        cost_kernel,
        out_shape=jax.ShapeDtypeStruct((B, N, Mp), jnp.float32),
        grid=(B, pl.cdiv(Mp, tm)),
        in_specs=[
            pl.BlockSpec((1, tm, C), lambda b, mt: (b, mt, 0)),
            pl.BlockSpec((1, 4, tm), lambda b, mt: (b, 0, mt)),
            pl.BlockSpec((1, N, 1), lambda b, mt: (b, 0, 0)),
            pl.BlockSpec((1, N, 4), lambda b, mt: (b, 0, 0)),
        ],
        out_specs=pl.BlockSpec((1, N, tm), lambda b, mt: (b, 0, mt)),
        compiler_params=pltpu.CompilerParams(
            dimension_semantics=("parallel", "parallel")),
    )(pred_cat_bf, pred_bbox_t, targ_cat_sub, targ_bbox_f)
    # device-side slice: D2H transfer carries only the real M columns
    return cost if pad == 0 else cost[:, :, :M]


# ----------------------------------------------------------------------------
# Kernel 2: per-batch final loss. Grid (B, Kt): the matched-prediction gather
# (exact one-hot matmul on the MXU) is tiled over M with VMEM accumulators, so
# per-step VMEM is bounded on every generation (incl. v7x's 64 MiB).
# ----------------------------------------------------------------------------
def make_loss_kernel(m_total):
    def loss_kernel(pred_cat_ref, pred_box_ref, assign_ref, targ_cat_ref,
                    targ_box_ref, out_ref, acc_logit_ref, acc_box_ref):
        # blocks: (1,TK,C) f32, (1,TK,4) f32, (1,N,1) i32, (1,N,1) i32, (1,N,4) f32 -> (1,1,1)
        k = pl.program_id(1)
        nk = pl.num_programs(1)
        tk = pred_cat_ref.shape[1]

        @pl.when(k == 0)
        def _():
            acc_logit_ref[...] = jnp.zeros_like(acc_logit_ref)
            acc_box_ref[...] = jnp.zeros_like(acc_box_ref)

        assign = assign_ref[0]                          # (N, 1) int32 Hungarian column
        n = assign.shape[0]
        row0 = k * tk

        # mask rows past M (ragged last tile) so stale VMEM never enters the dots
        valid = (jax.lax.broadcasted_iota(jnp.int32, (tk, 1), 0) + row0) < m_total
        logits_t = jnp.where(valid, pred_cat_ref[0], 0.0)            # (TK, C)
        box_t = jnp.where(valid, pred_box_ref[0], 0.0)               # (TK, 4)

        # exact one-hot row-gather of the matched predictions (MXU), accumulated over M
        sel = ((jax.lax.broadcasted_iota(jnp.int32, (n, tk), 1) + row0) == assign
               ).astype(jnp.float32)                                 # (N, TK)
        acc_logit_ref[...] += jax.lax.dot_general(
            sel, logits_t, dimension_numbers=(((1,), (0,)), ((), ())),
            preferred_element_type=jnp.float32)                      # (N, C)
        acc_box_ref[...] += jax.lax.dot_general(
            sel, box_t, dimension_numbers=(((1,), (0,)), ((), ())),
            preferred_element_type=jnp.float32)                      # (N, 4)

        @pl.when(k == nk - 1)
        def _():
            logits = acc_logit_ref[...]                 # (N, C) matched logits
            pbox = acc_box_ref[...]                     # (N, 4) matched boxes (cxcywh)
            tc = targ_cat_ref[0]                        # (N, 1) int32
            tbox = targ_box_ref[0]                      # (N, 4) cxcywh
            c = logits.shape[1]

            # ---- cross-entropy over classes, mean over N (no masking, as in reference) ----
            oh = (jax.lax.broadcasted_iota(jnp.int32, (n, c), 1) == tc).astype(jnp.float32)
            mx = jnp.max(logits, axis=-1, keepdims=True)
            lse = mx + jnp.log(jnp.sum(jnp.exp(logits - mx), axis=-1, keepdims=True))
            ce = lse - jnp.sum(logits * oh, axis=-1, keepdims=True)  # (N, 1)
            cat_loss = jnp.sum(ce, axis=0, keepdims=True) * (LOSS_CAT / n)   # (1, 1)

            # ---- bbox loss on matched pairs (exact divides: this is the returned loss) ----
            pcx, pcy, pw, ph = pbox[:, 0:1], pbox[:, 1:2], pbox[:, 2:3], pbox[:, 3:4]
            px1, py1 = pcx - 0.5 * pw, pcy - 0.5 * ph
            px2, py2 = pcx + 0.5 * pw, pcy + 0.5 * ph
            tcx, tcy, tw, th = tbox[:, 0:1], tbox[:, 1:2], tbox[:, 2:3], tbox[:, 3:4]
            tx1, ty1 = tcx - 0.5 * tw, tcy - 0.5 * th
            tx2, ty2 = tcx + 0.5 * tw, tcy + 0.5 * th

            area_p = (px2 - px1) * (py2 - py1)
            area_t = (tx2 - tx1) * (ty2 - ty1)
            ix1 = jnp.maximum(tx1, px1)
            iy1 = jnp.maximum(ty1, py1)
            ix2 = jnp.minimum(tx2, px2)
            iy2 = jnp.minimum(ty2, py2)
            inter = jnp.maximum(ix2 - ix1, 0.0) * jnp.maximum(iy2 - iy1, 0.0)
            union = area_p + area_t - inter
            iou = inter / (union + EPS)
            cx1 = jnp.minimum(tx1, px1)
            cy1 = jnp.minimum(ty1, py1)
            cx2 = jnp.maximum(tx2, px2)
            cy2 = jnp.maximum(ty2, py2)
            area_c = (cx2 - cx1) * (cy2 - cy1)
            giou = iou - (area_c - union) / (area_c + EPS)
            loss_iou = 1.0 - giou                                    # (N, 1)

            l1 = 0.25 * (jnp.abs(px1 - tx1) + jnp.abs(py1 - ty1)
                         + jnp.abs(px2 - tx2) + jnp.abs(py2 - ty2))  # (N, 1)

            mask = (tc != 0).astype(jnp.float32)                     # (N, 1)
            lb = (loss_iou * COST_IOU + l1 * COST_L1) * mask         # (N, 1)
            n_fg = jnp.sum(mask, axis=0, keepdims=True)              # (1, 1)
            bbox_loss = jnp.sum(lb, axis=0, keepdims=True) / (n_fg + 1e-7)   # (1, 1)

            out_ref[0] = cat_loss + bbox_loss                        # (1, 1)

    return loss_kernel


def compute_final_loss(pred_cat, pred_bbox, assign_sub, targ_cat_sub, targ_bbox, *, tk):
    B, M, C = pred_cat.shape
    N = assign_sub.shape[1]
    kt = pl.cdiv(M, tk)
    return pl.pallas_call(
        make_loss_kernel(M),
        out_shape=jax.ShapeDtypeStruct((B, 1, 1), jnp.float32),
        grid=(B, kt),
        in_specs=[
            pl.BlockSpec((1, tk, C), lambda b, k: (b, k, 0)),
            pl.BlockSpec((1, tk, 4), lambda b, k: (b, k, 0)),
            pl.BlockSpec((1, N, 1), lambda b, k: (b, 0, 0)),
            pl.BlockSpec((1, N, 1), lambda b, k: (b, 0, 0)),
            pl.BlockSpec((1, N, 4), lambda b, k: (b, 0, 0)),
        ],
        out_specs=pl.BlockSpec((1, 1, 1), lambda b, k: (b, 0, 0)),
        scratch_shapes=[pltpu.VMEM((N, C), jnp.float32),
                        pltpu.VMEM((N, 4), jnp.float32)],
        compiler_params=pltpu.CompilerParams(
            dimension_semantics=("parallel", "arbitrary")),
    )(pred_cat, pred_bbox, assign_sub, targ_cat_sub, targ_bbox)


@jax.jit
def _final_loss(pred_cat, pred_bbox, assign, targ_cat, targ_bbox):
    B, M, C = pred_cat.shape
    # tk == M (full dim, always a legal block) when M <= 512, else 512-wide tiles
    tk = M if M <= 512 else 512
    loss_b = compute_final_loss(
        pred_cat.astype(jnp.float32), pred_bbox.astype(jnp.float32),
        assign.astype(jnp.int32)[..., None],
        targ_cat.astype(jnp.int32)[..., None],
        targ_bbox.astype(jnp.float32), tk=tk)
    return jnp.mean(loss_b)


# ----------------------------------------------------------------------------
# Host-side Hungarian algorithm (min-cost assignment, N <= M) -> col_ind per row.
# scipy if available, else a numpy-vectorized Jonker-Volgenant.
# TODO(synk): the combinatorial assignment has no clean Pallas equivalent; it
#             runs on host, exactly like the .cpu() scipy call in the PyTorch code.
# ----------------------------------------------------------------------------
def linear_sum_assignment_cols(cost):
    cost = np.asarray(cost, dtype=np.float64)
    n, m = cost.shape
    assert n <= m
    if _scipy_lsa is not None:
        _, col_ind = _scipy_lsa(cost)
        return col_ind.astype(np.int32)
    INF = 1e18
    u = np.zeros(n + 1)
    v = np.zeros(m + 1)
    p = np.zeros(m + 1, dtype=np.int64)     # p[j] = row (1-indexed) assigned to col j
    way = np.zeros(m + 1, dtype=np.int64)
    for i in range(1, n + 1):
        p[0] = i
        j0 = 0
        minv = np.full(m + 1, INF)
        used = np.zeros(m + 1, dtype=bool)
        while True:
            used[j0] = True
            i0 = p[j0]
            free = ~used[1:]
            cur = cost[i0 - 1, :] - u[i0] - v[1:]
            better = free & (cur < minv[1:])
            minv[1:] = np.where(better, cur, minv[1:])
            way[1:][better] = j0
            masked = np.where(free, minv[1:], INF)
            j1 = int(np.argmin(masked)) + 1
            delta = masked[j1 - 1]
            np.add.at(u, p[used], delta)
            v[used] -= delta
            minv[1:][free] -= delta
            j0 = j1
            if p[j0] == 0:
                break
        while True:
            j1 = way[j0]
            p[j0] = p[j1]
            j0 = j1
            if j0 == 0:
                break
    col_ind = np.zeros(n, dtype=np.int32)
    for j in range(1, m + 1):
        if p[j] > 0:
            col_ind[p[j] - 1] = j - 1
    return col_ind


# ----------------------------------------------------------------------------
# Full HungarianLoss forward
# ----------------------------------------------------------------------------
def hungarian_loss(pred_cat, pred_bbox, targ_cat, targ_bbox):
    B, M, C = pred_cat.shape
    N = targ_cat.shape[1]
    assert N <= M, "Hungarian assignment requires N <= M"

    # --- cost matrix (no-grad region in PyTorch); padded columns dropped on device ---
    cost = _cost_matrix(pred_cat, pred_bbox, targ_cat, targ_bbox)    # (B, N, M) f32
    cost_np = jax.device_get(cost)

    # --- Hungarian assignment per batch (host, thread pool like the reference) ---
    with ThreadPoolExecutor(max_workers=min(max(B, 1), 8)) as ex:
        assign = list(ex.map(linear_sum_assignment_cols, list(cost_np)))
    assign_j = jnp.asarray(np.stack(assign).astype(np.int32))        # (B, N)

    # --- final loss (matched-prediction gather fused into the tiled loss kernel) ---
    loss = _final_loss(pred_cat, pred_bbox, assign_j, targ_cat, targ_bbox)
    return loss, assign_j


if __name__ == "__main__":
    key = jax.random.PRNGKey(0)
    B, M, N, C = 2, 8, 8, 4
    k1, k2, k3, k4, k5, k6 = jax.random.split(key, 6)

    pred_cat = jax.random.normal(k1, (B, M, C), dtype=jnp.float32)
    pred_cxy = jax.random.uniform(k2, (B, M, 2), minval=0.2, maxval=0.8)
    pred_wh = jax.random.uniform(k3, (B, M, 2), minval=0.1, maxval=0.4)
    pred_bbox = jnp.concatenate([pred_cxy, pred_wh], axis=-1)        # cxcywh

    targ_cat = jax.random.randint(k4, (B, N), 0, C, dtype=jnp.int32)
    targ_cxy = jax.random.uniform(k5, (B, N, 2), minval=0.2, maxval=0.8)
    targ_wh = jax.random.uniform(k6, (B, N, 2), minval=0.1, maxval=0.4)
    targ_bbox = jnp.concatenate([targ_cxy, targ_wh], axis=-1)        # cxcywh

    loss, assign = hungarian_loss(pred_cat, pred_bbox, targ_cat, targ_bbox)
    loss = jax.block_until_ready(loss)
    assign = jax.block_until_ready(assign)

    assert np.isfinite(float(loss))
    assert assign.shape == (B, N)
    assert int(np.max(np.asarray(assign))) < M and int(np.min(np.asarray(assign))) >= 0
    print("KERNEL_OK")
</pallas_src>

<mosaic_0001>
module attributes {stable_mosaic.version = 11 : i64} {
  func.func @cost_kernel(%arg0: i32, %arg1: i32, %arg2: memref<1x128x4xbf16, #tpu.memory_space<vmem>>, %arg3: memref<1x4x128xf32, #tpu.memory_space<vmem>>, %arg4: memref<1x8x1xi32, #tpu.memory_space<vmem>>, %arg5: memref<1x8x4xf32, #tpu.memory_space<vmem>>, %arg6: memref<1x8x128xf32, #tpu.memory_space<vmem>>) attributes {dimension_semantics = [#tpu.dimension_semantics<parallel>, #tpu.dimension_semantics<parallel>], iteration_bounds = array<i64: 2, 1>, scalar_prefetch = 0 : i64, scratch_operands = 0 : i64, tpu.core_type = #tpu.core_type<tc>, window_params = [{transform_indices = @transform_0, window_bounds = array<i64: 1, 128, 4>}, {transform_indices = @transform_1, window_bounds = array<i64: 1, 4, 128>}, {transform_indices = @transform_2, window_bounds = array<i64: 1, 8, 1>}, {transform_indices = @transform_3, window_bounds = array<i64: 1, 8, 4>}, {transform_indices = @transform_4, window_bounds = array<i64: 1, 8, 128>}]} {
    %c0 = arith.constant 0 : index
    %c0_0 = arith.constant 0 : index
    %c0_1 = arith.constant 0 : index
    %0 = vector.load %arg2[%c0, %c0_0, %c0_1] : memref<1x128x4xbf16, #tpu.memory_space<vmem>>, vector<1x128x4xbf16>
    %1 = vector.shape_cast %0 : vector<1x128x4xbf16> to vector<128x4xbf16>
    %2 = arith.extf %1 : vector<128x4xbf16> to vector<128x4xf32>
    %c0_2 = arith.constant 0 : index
    %c0_3 = arith.constant 0 : index
    %c0_4 = arith.constant 0 : index
    %3 = vector.load %arg3[%c0_2, %c0_3, %c0_4] : memref<1x4x128xf32, #tpu.memory_space<vmem>>, vector<1x4x128xf32>
    %4 = vector.shape_cast %3 : vector<1x4x128xf32> to vector<4x128xf32>
    %c0_5 = arith.constant 0 : index
    %c0_6 = arith.constant 0 : index
    %c0_7 = arith.constant 0 : index
    %5 = vector.load %arg4[%c0_5, %c0_6, %c0_7] : memref<1x8x1xi32, #tpu.memory_space<vmem>>, vector<1x8x1xi32>
    %6 = vector.shape_cast %5 : vector<1x8x1xi32> to vector<8x1xi32>
    %c0_8 = arith.constant 0 : index
    %c0_9 = arith.constant 0 : index
    %c0_10 = arith.constant 0 : index
    %7 = vector.load %arg5[%c0_8, %c0_9, %c0_10] : memref<1x8x4xf32, #tpu.memory_space<vmem>>, vector<1x8x4xf32>
    %8 = vector.shape_cast %7 : vector<1x8x4xf32> to vector<8x4xf32>
    %9 = tpu.iota {dimensions = array<i32: 1>} : vector<8x4xi32>
    %10 = vector.broadcast %6 : vector<8x1xi32> to vector<8x4xi32>
    %11 = arith.cmpi eq, %9, %10 : vector<8x4xi32>
    %12 = arith.extui %11 : vector<8x4xi1> to vector<8x4xi32>
    %13 = arith.sitofp %12 : vector<8x4xi32> to vector<8x4xf32>
    %c0_i32 = arith.constant 0 : i32
    %14 = vector.broadcast %c0_i32 : i32 to vector<8x1xi32>
    %15 = arith.cmpi ne, %6, %14 : vector<8x1xi32>
    %16 = arith.extui %15 : vector<8x1xi1> to vector<8x1xi32>
    %17 = arith.sitofp %16 : vector<8x1xi32> to vector<8x1xf32>
    %cst = arith.constant dense<0xFF800000> : vector<128xf32>
    %18 = vector.multi_reduction <maximumf>, %2, %cst [1] : vector<128x4xf32> to vector<128xf32>
    %19 = vector.shape_cast %18 : vector<128xf32> to vector<128x1xf32>
    %20 = vector.broadcast %19 : vector<128x1xf32> to vector<128x4xf32>
    %21 = arith.subf %2, %20 : vector<128x4xf32>
    %22 = math.exp %21 : vector<128x4xf32>
    %cst_11 = arith.constant dense<0.000000e+00> : vector<128xf32>
    %23 = vector.multi_reduction <add>, %22, %cst_11 [1] : vector<128x4xf32> to vector<128xf32>
    %24 = vector.shape_cast %23 : vector<128xf32> to vector<128x1xf32>
    %25 = tpu.reciprocal %24 {approx = true} : vector<128x1xf32> -> vector<128x1xf32>
    %26 = vector.broadcast %25 : vector<128x1xf32> to vector<128x4xf32>
    %27 = arith.mulf %22, %26 : vector<128x4xf32>
    %cst_12 = arith.constant dense<0.000000e+00> : vector<8x128xf32>
    %28 = tpu.matmul %13, %27, %cst_12 {dimension_numbers = #tpu.dot_dimension_numbers<[1], [1], [0], [0], [0, 0, 1, 0], [], []>} : vector<8x4xf32>, vector<128x4xf32>, vector<8x128xf32> -> vector<8x128xf32>
    %cst_13 = arith.constant 1.000000e+00 : f32
    %29 = vector.broadcast %cst_13 : f32 to vector<8x128xf32>
    %30 = arith.subf %29, %28 : vector<8x128xf32>
    %cst_14 = arith.constant 1.000000e+00 : f32
    %31 = vector.broadcast %cst_14 : f32 to vector<8x128xf32>
    %32 = arith.mulf %30, %31 : vector<8x128xf32>
    %33 = vector.extract_strided_slice %4 {offsets = [0, 0], sizes = [1, 128], strides = [1, 1]} : vector<4x128xf32> to vector<1x128xf32>
    %34 = vector.extract_strided_slice %4 {offsets = [1, 0], sizes = [1, 128], strides = [1, 1]} : vector<4x128xf32> to vector<1x128xf32>
    %35 = vector.extract_strided_slice %4 {offsets = [2, 0], sizes = [1, 128], strides = [1, 1]} : vector<4x128xf32> to vector<1x128xf32>
    %36 = vector.extract_strided_slice %4 {offsets = [3, 0], sizes = [1, 128], strides = [1, 1]} : vector<4x128xf32> to vector<1x128xf32>
    %cst_15 = arith.constant 5.000000e-01 : f32
    %37 = vector.broadcast %cst_15 : f32 to vector<1x128xf32>
    %38 = arith.mulf %37, %35 : vector<1x128xf32>
    %39 = arith.subf %33, %38 : vector<1x128xf32>
    %cst_16 = arith.constant 5.000000e-01 : f32
    %40 = vector.broadcast %cst_16 : f32 to vector<1x128xf32>
    %41 = arith.mulf %40, %36 : vector<1x128xf32>
    %42 = arith.subf %34, %41 : vector<1x128xf32>
    %cst_17 = arith.constant 5.000000e-01 : f32
    %43 = vector.broadcast %cst_17 : f32 to vector<1x128xf32>
    %44 = arith.mulf %43, %35 : vector<1x128xf32>
    %45 = arith.addf %33, %44 : vector<1x128xf32>
    %cst_18 = arith.constant 5.000000e-01 : f32
    %46 = vector.broadcast %cst_18 : f32 to vector<1x128xf32>
    %47 = arith.mulf %46, %36 : vector<1x128xf32>
    %48 = arith.addf %34, %47 : vector<1x128xf32>
    %49 = vector.extract_strided_slice %8 {offsets = [0, 0], sizes = [8, 1], strides = [1, 1]} : vector<8x4xf32> to vector<8x1xf32>
    %50 = vector.extract_strided_slice %8 {offsets = [0, 1], sizes = [8, 1], strides = [1, 1]} : vector<8x4xf32> to vector<8x1xf32>
    %51 = vector.extract_strided_slice %8 {offsets = [0, 2], sizes = [8, 1], strides = [1, 1]} : vector<8x4xf32> to vector<8x1xf32>
    %52 = vector.extract_strided_slice %8 {offsets = [0, 3], sizes = [8, 1], strides = [1, 1]} : vector<8x4xf32> to vector<8x1xf32>
    %cst_19 = arith.constant 5.000000e-01 : f32
    %53 = vector.broadcast %cst_19 : f32 to vector<8x1xf32>
    %54 = arith.mulf %53, %51 : vector<8x1xf32>
    %55 = arith.subf %49, %54 : vector<8x1xf32>
    %cst_20 = arith.constant 5.000000e-01 : f32
    %56 = vector.broadcast %cst_20 : f32 to vector<8x1xf32>
    %57 = arith.mulf %56, %52 : vector<8x1xf32>
    %58 = arith.subf %50, %57 : vector<8x1xf32>
    %cst_21 = arith.constant 5.000000e-01 : f32
    %59 = vector.broadcast %cst_21 : f32 to vector<8x1xf32>
    %60 = arith.mulf %59, %51 : vector<8x1xf32>
    %61 = arith.addf %49, %60 : vector<8x1xf32>
    %cst_22 = arith.constant 5.000000e-01 : f32
    %62 = vector.broadcast %cst_22 : f32 to vector<8x1xf32>
    %63 = arith.mulf %62, %52 : vector<8x1xf32>
    %64 = arith.addf %50, %63 : vector<8x1xf32>
    %65 = arith.subf %45, %39 : vector<1x128xf32>
    %66 = arith.subf %48, %42 : vector<1x128xf32>
    %67 = arith.mulf %65, %66 : vector<1x128xf32>
    %68 = arith.subf %61, %55 : vector<8x1xf32>
    %69 = arith.subf %64, %58 : vector<8x1xf32>
    %70 = arith.mulf %68, %69 : vector<8x1xf32>
    %71 = vector.broadcast %55 : vector<8x1xf32> to vector<8x128xf32>
    %72 = vector.broadcast %39 : vector<1x128xf32> to vector<8x128xf32>
    %73 = arith.maximumf %71, %72 : vector<8x128xf32>
    %74 = vector.broadcast %58 : vector<8x1xf32> to vector<8x128xf32>
    %75 = vector.broadcast %42 : vector<1x128xf32> to vector<8x128xf32>
    %76 = arith.maximumf %74, %75 : vector<8x128xf32>
    %77 = vector.broadcast %61 : vector<8x1xf32> to vector<8x128xf32>
    %78 = vector.broadcast %45 : vector<1x128xf32> to vector<8x128xf32>
    %79 = arith.minimumf %77, %78 : vector<8x128xf32>
    %80 = vector.broadcast %64 : vector<8x1xf32> to vector<8x128xf32>
    %81 = vector.broadcast %48 : vector<1x128xf32> to vector<8x128xf32>
    %82 = arith.minimumf %80, %81 : vector<8x128xf32>
    %83 = arith.subf %79, %73 : vector<8x128xf32>
    %cst_23 = arith.constant 0.000000e+00 : f32
    %84 = vector.broadcast %cst_23 : f32 to vector<8x128xf32>
    %85 = arith.maximumf %83, %84 : vector<8x128xf32>
    %86 = arith.subf %82, %76 : vector<8x128xf32>
    %cst_24 = arith.constant 0.000000e+00 : f32
    %87 = vector.broadcast %cst_24 : f32 to vector<8x128xf32>
    %88 = arith.maximumf %86, %87 : vector<8x128xf32>
    %89 = arith.mulf %85, %88 : vector<8x128xf32>
    %90 = vector.broadcast %67 : vector<1x128xf32> to vector<8x128xf32>
    %91 = vector.broadcast %70 : vector<8x1xf32> to vector<8x128xf32>
    %92 = arith.addf %90, %91 : vector<8x128xf32>
    %93 = arith.subf %92, %89 : vector<8x128xf32>
    %cst_25 = arith.constant 1.000000e-07 : f32
    %94 = vector.broadcast %cst_25 : f32 to vector<8x128xf32>
    %95 = arith.addf %93, %94 : vector<8x128xf32>
    %96 = tpu.reciprocal %95 {approx = true} : vector<8x128xf32> -> vector<8x128xf32>
    %97 = arith.mulf %89, %96 : vector<8x128xf32>
    %98 = vector.broadcast %55 : vector<8x1xf32> to vector<8x128xf32>
    %99 = vector.broadcast %39 : vector<1x128xf32> to vector<8x128xf32>
    %100 = arith.minimumf %98, %99 : vector<8x128xf32>
    %101 = vector.broadcast %58 : vector<8x1xf32> to vector<8x128xf32>
    %102 = vector.broadcast %42 : vector<1x128xf32> to vector<8x128xf32>
    %103 = arith.minimumf %101, %102 : vector<8x128xf32>
    %104 = vector.broadcast %61 : vector<8x1xf32> to vector<8x128xf32>
    %105 = vector.broadcast %45 : vector<1x128xf32> to vector<8x128xf32>
    %106 = arith.maximumf %104, %105 : vector<8x128xf32>
    %107 = vector.broadcast %64 : vector<8x1xf32> to vector<8x128xf32>
    %108 = vector.broadcast %48 : vector<1x128xf32> to vector<8x128xf32>
    %109 = arith.maximumf %107, %108 : vector<8x128xf32>
    %110 = arith.subf %106, %100 : vector<8x128xf32>
    %111 = arith.subf %109, %103 : vector<8x128xf32>
    %112 = arith.mulf %110, %111 : vector<8x128xf32>
    %113 = arith.subf %112, %93 : vector<8x128xf32>
    %cst_26 = arith.constant 1.000000e-07 : f32
    %114 = vector.broadcast %cst_26 : f32 to vector<8x128xf32>
    %115 = arith.addf %112, %114 : vector<8x128xf32>
    %116 = tpu.reciprocal %115 {approx = true} : vector<8x128xf32> -> vector<8x128xf32>
    %117 = arith.mulf %113, %116 : vector<8x128xf32>
    %118 = arith.subf %97, %117 : vector<8x128xf32>
    %cst_27 = arith.constant 1.000000e+00 : f32
    %119 = vector.broadcast %cst_27 : f32 to vector<8x128xf32>
    %120 = arith.subf %119, %118 : vector<8x128xf32>
    %121 = vector.broadcast %39 : vector<1x128xf32> to vector<8x128xf32>
    %122 = vector.broadcast %55 : vector<8x1xf32> to vector<8x128xf32>
    %123 = arith.subf %121, %122 : vector<8x128xf32>
    %124 = math.absf %123 : vector<8x128xf32>
    %125 = vector.broadcast %42 : vector<1x128xf32> to vector<8x128xf32>
    %126 = vector.broadcast %58 : vector<8x1xf32> to vector<8x128xf32>
    %127 = arith.subf %125, %126 : vector<8x128xf32>
    %128 = math.absf %127 : vector<8x128xf32>
    %129 = arith.addf %124, %128 : vector<8x128xf32>
    %130 = vector.broadcast %45 : vector<1x128xf32> to vector<8x128xf32>
    %131 = vector.broadcast %61 : vector<8x1xf32> to vector<8x128xf32>
    %132 = arith.subf %130, %131 : vector<8x128xf32>
    %133 = math.absf %132 : vector<8x128xf32>
    %134 = arith.addf %129, %133 : vector<8x128xf32>
    %135 = vector.broadcast %48 : vector<1x128xf32> to vector<8x128xf32>
    %136 = vector.broadcast %64 : vector<8x1xf32> to vector<8x128xf32>
    %137 = arith.subf %135, %136 : vector<8x128xf32>
    %138 = math.absf %137 : vector<8x128xf32>
    %139 = arith.addf %134, %138 : vector<8x128xf32>
    %cst_28 = arith.constant 2.500000e-01 : f32
    %140 = vector.broadcast %cst_28 : f32 to vector<8x128xf32>
    %141 = arith.mulf %140, %139 : vector<8x128xf32>
    %cst_29 = arith.constant 2.000000e+00 : f32
    %142 = vector.broadcast %cst_29 : f32 to vector<8x128xf32>
    %143 = arith.mulf %120, %142 : vector<8x128xf32>
    %cst_30 = arith.constant 5.000000e+00 : f32
    %144 = vector.broadcast %cst_30 : f32 to vector<8x128xf32>
    %145 = arith.mulf %141, %144 : vector<8x128xf32>
    %146 = arith.addf %143, %145 : vector<8x128xf32>
    %147 = vector.broadcast %17 : vector<8x1xf32> to vector<8x128xf32>
    %148 = arith.mulf %146, %147 : vector<8x128xf32>
    %149 = arith.addf %32, %148 : vector<8x128xf32>
    %c0_31 = arith.constant 0 : index
    %c0_32 = arith.constant 0 : index
    %c0_33 = arith.constant 0 : index
    %150 = vector.load %arg6[%c0_31, %c0_32, %c0_33] : memref<1x8x128xf32, #tpu.memory_space<vmem>>, vector<1x8x128xf32>
    %151 = vector.shape_cast %150 : vector<1x8x128xf32> to vector<8x128xf32>
    %152 = vector.shape_cast %149 : vector<8x128xf32> to vector<1x8x128xf32>
    tpu.vector_store %arg6[%c0_31, %c0_32, %c0_33], %152 {strides = array<i32>} : memref<1x8x128xf32, #tpu.memory_space<vmem>>, vector<1x8x128xf32>,
    return
  }
  func.func @transform_0(%arg0: i32, %arg1: i32) -> (i32, i32, i32) {
    %c0_i32 = arith.constant 0 : i32
    %c0_i32_0 = arith.constant 0 : i32
    return %arg0, %arg1, %c0_i32 : i32, i32, i32
  }
  func.func @transform_1(%arg0: i32, %arg1: i32) -> (i32, i32, i32) {
    %c0_i32 = arith.constant 0 : i32
    %c0_i32_0 = arith.constant 0 : i32
    return %arg0, %c0_i32, %arg1 : i32, i32, i32
  }
  func.func @transform_2(%arg0: i32, %arg1: i32) -> (i32, i32, i32) {
    %c0_i32 = arith.constant 0 : i32
    %c0_i32_0 = arith.constant 0 : i32
    %c0_i32_1 = arith.constant 0 : i32
    return %arg0, %c0_i32, %c0_i32_0 : i32, i32, i32
  }
  func.func @transform_3(%arg0: i32, %arg1: i32) -> (i32, i32, i32) {
    %c0_i32 = arith.constant 0 : i32
    %c0_i32_0 = arith.constant 0 : i32
    %c0_i32_1 = arith.constant 0 : i32
    return %arg0, %c0_i32, %c0_i32_0 : i32, i32, i32
  }
  func.func @transform_4(%arg0: i32, %arg1: i32) -> (i32, i32, i32) {
    %c0_i32 = arith.constant 0 : i32
    %c0_i32_0 = arith.constant 0 : i32
    return %arg0, %c0_i32, %arg1 : i32, i32, i32
  }
}

</mosaic_0001>

<bundles_post_ra>
// kernel: _cost_matrix.1
= control target key start
LH: loop header
LB: loop body
LE: loop exit
PB: predicated region body
PF: predicated region fallthrough
CT: control target
= control target key end

     0   :  { %9 = vsyncpa [#allocation3], 0  ;;  %s1647_s0 = inlined_call_operand.vmem [shape: bf16[2,128,4], index: 0, kind: input, shape index: {}]   ;;  %s1648_s1 = inlined_call_operand.vmem [shape: f32[2,4,128], index: 1, kind: input, shape index: {}]   ;;  %s1649_s2 = inlined_call_operand.vmem [shape: s32[2,8,1], index: 2, kind: input, shape index: {}]   ;;  %s1650_s3 = inlined_call_operand.vmem [shape: f32[2,8,4], index: 3, kind: input, shape index: {}]   ;;  %s1651_s4 = inlined_call_operand.hbm [shape: f32[2,8,128], index: 4, kind: output, shape index: {}]  }
   0x1   :  { %11 = vsyncpa [#allocation3 + $0x1], 0  ;;  %s1285_s15 = smov 0   ;;  %s1287_s16 = smov 0  }
   0x2   :  { %s1289_s17 = smov 0   ;;  %s1291_s18 = smov 0  }
   0x3   :  { %s1293_s19 = smov 0   ;;  %s1295_s20 = smov 0  }
   0x4 LB: > { %s878_s21 = sadd.s32 4294967295, %s1250_s20   ;;  %s879_s22 = sadd.s32 4294967294, %s1250_s20   ;;  %s1250_s20 = sphi %s1295_s20, %s17_s20   ;;  %s1246_s19 = sphi %s1293_s19, %s1660_s19   ;;  %s1242_s18 = sphi %s1291_s18, %s1659_s18   ;;  %s1238_s17 = sphi %s1289_s17, %s1658_s17   ;;  %s1234_s16 = sphi %s1287_s16, %s1657_s16   ;;  %s1230_s15 = sphi %s1285_s15, %s1656_s15  }
   0x5   : > { %s29_s23 = sadd.s32 1, %s1246_s19  ;;  %s146_s24 = sadd.s32 1, %s1238_s17 }
   0x6   : > { %p31_p0 = scmp.ge.s32.totalorder %s29_s23, 2  ;;  %p156_p1 = scmp.ne.s32.totalorder %s1238_s17, %s1234_s16 }
   0x7   : > { %p157_p2 = scmp.eq.s32.totalorder %s878_s21, 1  ;;  %p162_p3 = scmp.ne.s32.totalorder %s1234_s16, %s1230_s15 }
   0x8   : > { %s1662_s23 = smov (%p31_p0, %s29_s23), 0  ;;  %p163_p5 = scmp.eq.s32.totalorder %s879_s22, 1 }
   0x9   : > { %p1325_p4 = por %p157_p2, %p156_p1  ;;  %s141_s26 = ssub.s32 %s1246_s19, %s1662_s23 }
   0xa   : > { %p882_p6 = scmp.ge.s32.totalorder %s1250_s20, 1  ;;  %p144_p7 = scmp.eq.s32.totalorder %s141_s26, 0 }
   0xb   : > { %p1332_p8 = por %p163_p5, %p162_p3  ;;  %p218_p9 = scmp.lt.s32.totalorder %s1250_s20, 3 }
   0xc   : > { %s1338_s28 = scalar_select %p144_p7, %s1238_s17, %s146_s24  }
   0xd   : > { %p219_p10 = pnand %p882_p6, %p218_p9 }
   0xe   : > { %p264_p11 = scmp.lt.s32.totalorder (!%p219_p10), %s1242_s18, 1  ;;  %vm334_vm0 = vcmask (!%p219_p10), 31744   ;;  %v1252_v40 = vmov (!%p219_p10), 0   ;;  %s1254_s21 = smov (!%p219_p10), 126   ;;  %vm1255_vm1 = vmmov (!%p219_p10), 0  }
   0xf   : > { %222 = sbr.rel (%p219_p10) target bundleno = 660 (0x294), region = 36  ;;  %1098 = vset.pattern.permute.xlu0 (!%p219_p10), %v1252_v40  ;;  %1099 = vset.pattern.permute.xlu1 (!%p219_p10), %v1252_v40  ;;  %vm1544_vm2 = vmpackc.low (!%p219_p10), %vm334_vm0, %vm334_vm0  ;;  %s1257_s22 = smov (!%p219_p10), 127  }
  0x16   : > { %s1342_s29 = scalar_select %p264_p11, %s1242_s18, 1 }
  0x18   : > { %s912_s30 = sshll.u32 %s1342_s29, 6  ;;  %s887_s8 = sshll.u32 %s1342_s29, 3 }
  0x19   : > { %s1348_s7 = scalar_lea.vmem %s1647_s0, %s912_s30  ;;  %s287_s11 = scalar_lea.vmem %s1650_s3, %s887_s8 }
  0x1a   : > { %v1351_v0 = vld [vmem:[%s1348_s7] sm:$0xff]   ;;  %v1354_v1 = vld [vmem:[%s1348_s7 + $0x8] sm:$0xff]   ;;  %v1361_v6 = vld [vmem:[%s1348_s7 + $0x10] sm:$0xff]   ;;  %s283_s14 = scalar_lea.vmem %s1649_s2, %s887_s8  ;;  %s886_s24 = sshll.u32 %s1342_s29, 2 }
  0x1b   : > { %v915_v2 = vunpack.c.l.bf16 %v1351_v0  ;;  %v919_v3 = vunpack.c.l.bf16 %v1354_v1  ;;  %v916_v4 = vunpack.c.h.bf16 %v1351_v0  ;;  %v920_v5 = vunpack.c.h.bf16 %v1354_v1  ;;  %v1374_v13 = vld [vmem:[%s1348_s7 + $0x18] sm:$0xff]   ;;  %v1385_v18 = vld [vmem:[%s1348_s7 + $0x20] sm:$0xff]   ;;  %v1396_v23 = vld [vmem:[%s1348_s7 + $0x28] sm:$0xff]   ;;  %s279_s5 = scalar_lea.vmem %s1648_s1, %s886_s24  ;;  %s260_s29 = sand.u32 1, %s1234_s16  }
  0x1c   : > { %v923_v11 = vunpack.c.l.bf16 %v1361_v6  ;;  %v924_v12 = vunpack.c.h.bf16 %v1361_v6  ;;  %v927_v16 = vunpack.c.l.bf16 %v1374_v13  ;;  %v928_v17 = vunpack.c.h.bf16 %v1374_v13  ;;  %v1407_v28 = vld [vmem:[%s1348_s7 + $0x30] sm:$0xff]   ;;  %v1418_v33 = vld [vmem:[%s1348_s7 + $0x38] sm:$0xff]   ;;  %s883_s6 = sshll.u32 %s260_s29, 3  ;;  %s909_s7 = sshll.u32 %s1242_s18, 7 }
  0x1d   : > { %v335_v7 = vsel %vm334_vm0, %v915_v2, -inf  ;;  %v341_v8 = vsel %vm334_vm0, %v919_v3, -inf  ;;  %v338_v9 = vsel %vm334_vm0, %v916_v4, -inf  ;;  %v344_v10 = vsel %vm334_vm0, %v920_v5, -inf  ;;  %s262_s8 = scalar_lea.vmem [#allocation2], %s883_s6  ;;  %s1600_s12 = scalar_lea.hbm %s1651_s4, %s909_s7 }
  0x1e   : > { %336 = vmax.xlane.f32.xlu0 %v335_v7  ;;  %342 = vmax.xlane.f32.xlu1 %v341_v8  ;;  %v347_v14 = vsel %vm334_vm0, %v923_v11, -inf  ;;  %v350_v15 = vsel %vm334_vm0, %v924_v12, -inf  ;;  %v353_v19 = vsel %vm334_vm0, %v927_v16, -inf  ;;  %v356_v20 = vsel %vm334_vm0, %v928_v17, -inf  ;;  %s765_s9 = sshll.u32 %s262_s8, 4  ;;  %s751_s13 = scalar_lea.sflag [#allocation3], %s260_s29  ;;  %s1602_s9 = int_to_ptr.vmem [resolvable:$true] %s765_s9 }
  0x1f   : > { %v931_v21 = vunpack.c.l.bf16 %v1385_v18  ;;  %v932_v22 = vunpack.c.h.bf16 %v1385_v18  ;;  %v935_v26 = vunpack.c.l.bf16 %v1396_v23  ;;  %v936_v27 = vunpack.c.h.bf16 %v1396_v23  ;;  %s1259_s18 = smov [#allocation2]  }
  0x20   : > { %v939_v31 = vunpack.c.l.bf16 %v1407_v28  ;;  %v940_v32 = vunpack.c.h.bf16 %v1407_v28  ;;  %v943_v36 = vunpack.c.l.bf16 %v1418_v33  ;;  %v944_v37 = vunpack.c.h.bf16 %v1418_v33 }
  0x21   : > { %v359_v24 = vsel %vm334_vm0, %v931_v21, -inf  ;;  %v362_v25 = vsel %vm334_vm0, %v932_v22, -inf  ;;  %v365_v29 = vsel %vm334_vm0, %v935_v26, -inf  ;;  %v368_v30 = vsel %vm334_vm0, %v936_v27, -inf }
  0x22   : > { %339 = vmax.xlane.f32.xlu0 %v338_v9  ;;  %345 = vmax.xlane.f32.xlu1 %v344_v10  ;;  %v371_v34 = vsel %vm334_vm0, %v939_v31, -inf  ;;  %v374_v35 = vsel %vm334_vm0, %v940_v32, -inf  ;;  %v377_v38 = vsel %vm334_vm0, %v943_v36, -inf  ;;  %v380_v39 = vsel %vm334_vm0, %v944_v37, -inf }
  0x26   : > { %348 = vmax.xlane.f32.xlu0 %v347_v14  ;;  %351 = vmax.xlane.f32.xlu1 %v350_v15 }
  0x2a   : > { %354 = vmax.xlane.f32.xlu0 %v353_v19  ;;  %357 = vmax.xlane.f32.xlu1 %v356_v20 }
  0x2e   : > { %360 = vmax.xlane.f32.xlu0 %v359_v24  ;;  %363 = vmax.xlane.f32.xlu1 %v362_v25 }
  0x32   : > { %366 = vmax.xlane.f32.xlu0 %v365_v29  ;;  %369 = vmax.xlane.f32.xlu1 %v368_v30 }
  0x36   : > { %372 = vmax.xlane.f32.xlu0 %v371_v34  ;;  %375 = vmax.xlane.f32.xlu1 %v374_v35 }
  0x3a   : > { %378 = vmax.xlane.f32.xlu0 %v377_v38  ;;  %381 = vmax.xlane.f32.xlu1 %v380_v39 }
  0xab   : > { %v337_v41 = vpop.xlane.xlu0 %336  ;;  %v343_v42 = vpop.xlane.xlu1 %342 }
  0xac   : > { %v383_v43 = vsub.f32 %v915_v2, %v337_v41  ;;  %v385_v44 = vsub.f32 %v919_v3, %v343_v42 }
  0xae   : > { %v399_v45 = vmul.f32 1.442695, %v383_v43  ;;  %v403_v46 = vmul.f32 1.442695, %v385_v44 }
  0xaf   : > { %v340_v47 = vpop.xlane.xlu0 %339  ;;  %v346_v48 = vpop.xlane.xlu1 %345 }
  0xb0   : > { %1104 = vpow2.f32 %v399_v45  ;;  %v384_v49 = vsub.f32 %v916_v4, %v340_v47  ;;  %v386_v50 = vsub.f32 %v920_v5, %v346_v48 }
  0xb1   : > { %1106 = vpow2.f32 %v403_v46 }
  0xb2   : > { %v401_v51 = vmul.f32 1.442695, %v384_v49  ;;  %v405_v52 = vmul.f32 1.442695, %v386_v50 }
  0xb3   : > { %v349_v53 = vpop.xlane.xlu0 %348  ;;  %v352_v54 = vpop.xlane.xlu1 %351 }
  0xb4   : > { %1108 = vpow2.f32 %v401_v51  ;;  %v387_v55 = vsub.f32 %v923_v11, %v349_v53  ;;  %v388_v56 = vsub.f32 %v924_v12, %v352_v54 }
  0xb5   : > { %1110 = vpow2.f32 %v405_v52 }
  0xb6   : > { %v407_v57 = vmul.f32 1.442695, %v387_v55  ;;  %v409_v58 = vmul.f32 1.442695, %v388_v56 }
  0xb7   : > { %v355_v59 = vpop.xlane.xlu0 %354  ;;  %v358_v60 = vpop.xlane.xlu1 %357 }
  0xb8   : > { %1112 = vpow2.f32 %v407_v57  ;;  %v389_v61 = vsub.f32 %v927_v16, %v355_v59  ;;  %v390_v62 = vsub.f32 %v928_v17, %v358_v60  ;;  %v322_v59 = vld [vmem:[%s287_s11] sm:$0xff] }
  0xb9   : > { %1114 = vpow2.f32 %v409_v58  ;;  %v1253_v58 = vmov 0.0|0.0   ;;  %v639_v60 = vmul.f32 0.5, %v322_v59 }
  0xba   : > { %v1448_v63 = vpop.eup %1104  ;;  %v411_v0 = vmul.f32 1.442695, %v389_v61  ;;  %v413_v1 = vmul.f32 1.442695, %v390_v62  ;;  %1004 = vmatprep.subr.bf16.mxu0 %v1253_v58  ;;  %v1536_v61 = vld [vmem:[%s283_s14] sm:$0xff]  ;;  %v1256_v62 = vmov 0.0  }
  0xbb   : > { %v1450_v2 = vpop.eup %1106  ;;  %v361_v3 = vpop.xlane.xlu0 %360  ;;  %v431_v4 = vsel %vm334_vm0, %v1448_v63, 0.0  ;;  %1001 = vmatprep.mubr.msk.f32.mxu0 %vm1255_vm1, %v1256_v62  ;;  %vm331_vm4 = vcmp.ne.s32.totalorder %v1536_v61, 0  ;;  %s1172_s14 = scalar_lea.vmem %s1602_s9, 128 }
  0xbc   : > { %v364_v5 = vpop.xlane.xlu1 %363  ;;  %1116 = vpow2.f32 %v411_v0  ;;  %v391_v6 = vsub.f32 %v931_v21, %v361_v3  ;;  %432 = vadd.xlane.f32.xlu0 %v431_v4  ;;  %v437_v8 = vsel %vm334_vm0, %v1450_v2, 0.0  ;;  %p1173_p12 = scmp.ne.s32.totalorder %s1602_s9, %s1172_s14 }
  0xbd   : > { %v392_v7 = vsub.f32 %v932_v22, %v364_v5  ;;  %1118 = vpow2.f32 %v413_v1 }
  0xbe   : > { %v1460_v9 = vpop.eup %1108  ;;  %v415_v10 = vmul.f32 1.442695, %v391_v6  ;;  %p1174_p13 = pnand %p1173_p12, %p1325_p4 }
  0xbf   : > { %v417_v11 = vmul.f32 1.442695, %v392_v7  ;;  %v1462_v12 = vpop.eup %1110  ;;  %v367_v13 = vpop.xlane.xlu0 %366  ;;  %v434_v14 = vsel %vm334_vm0, %v1460_v9, 0.0 }
  0xc0   : > { %v370_v15 = vpop.xlane.xlu1 %369  ;;  %1120 = vpow2.f32 %v415_v10  ;;  %v393_v16 = vsub.f32 %v935_v26, %v367_v13  ;;  %438 = vadd.xlane.f32.xlu0 %v437_v8  ;;  %435 = vadd.xlane.f32.xlu1 %v434_v14  ;;  %v440_v18 = vsel %vm334_vm0, %v1462_v12, 0.0  ;;  %p1175_p0 = pneg %p1174_p13 }
  0xc1   : > { %v394_v17 = vsub.f32 %v936_v27, %v370_v15  ;;  %1122 = vpow2.f32 %v417_v11 }
  0xc2   : > { %v1472_v19 = vpop.eup %1112  ;;  %v419_v20 = vmul.f32 1.442695, %v393_v16 }
  0xc3   : > { %v421_v21 = vmul.f32 1.442695, %v394_v17  ;;  %v1474_v22 = vpop.eup %1114  ;;  %v373_v24 = vpop.xlane.xlu0 %372  ;;  %v443_v25 = vsel %vm334_vm0, %v1472_v19, 0.0 }
  0xc4   : > { %v376_v26 = vpop.xlane.xlu1 %375  ;;  %1124 = vpow2.f32 %v419_v20  ;;  %v395_v23 = vsub.f32 %v939_v31, %v373_v24  ;;  %441 = vadd.xlane.f32.xlu1 %v440_v18  ;;  %444 = vadd.xlane.f32.xlu0 %v443_v25  ;;  %v446_v29 = vsel %vm334_vm0, %v1474_v22, 0.0 }
  0xc5   : > { %v396_v27 = vsub.f32 %v940_v32, %v376_v26  ;;  %1126 = vpow2.f32 %v421_v21 }
  0xc6   : > { %v1484_v30 = vpop.eup %1116  ;;  %v423_v34 = vmul.f32 1.442695, %v395_v23 }
  0xc7   : > { %v425_v35 = vmul.f32 1.442695, %v396_v27  ;;  %v1486_v38 = vpop.eup %1118  ;;  %v379_v39 = vpop.xlane.xlu0 %378  ;;  %v449_v41 = vsel %vm334_vm0, %v1484_v30, 0.0 }
  0xc8   : > { %v382_v31 = vpop.xlane.xlu1 %381  ;;  %1128 = vpow2.f32 %v423_v34  ;;  %v397_v28 = vsub.f32 %v943_v36, %v379_v39  ;;  %447 = vadd.xlane.f32.xlu1 %v446_v29  ;;  %450 = vadd.xlane.f32.xlu0 %v449_v41  ;;  %v452_v42 = vsel %vm334_vm0, %v1486_v38, 0.0 }
  0xc9   : > { %v398_v32 = vsub.f32 %v944_v37, %v382_v31  ;;  %1130 = vpow2.f32 %v425_v35 }
  0xca   : > { %v1496_v43 = vpop.eup %1120  ;;  %v427_v44 = vmul.f32 1.442695, %v397_v28 }
  0xcb   : > { %v429_v45 = vmul.f32 1.442695, %v398_v32  ;;  %v1498_v46 = vpop.eup %1122  ;;  %v455_v47 = vsel %vm334_vm0, %v1496_v43, 0.0 }
  0xcc   : > { %1132 = vpow2.f32 %v427_v44  ;;  %453 = vadd.xlane.f32.xlu1 %v452_v42  ;;  %456 = vadd.xlane.f32.xlu0 %v455_v47  ;;  %v458_v33 = vsel %vm334_vm0, %v1498_v46, 0.0 }
  0xcd   : > { %1134 = vpow2.f32 %v429_v45 }
  0xce   : > { %v1504_v36 = vpop.eup %1124 }
  0xcf   : > { %v1506_v37 = vpop.eup %1126  ;;  %v461_v48 = vsel %vm334_vm0, %v1504_v36, 0.0 }
  0xd0   : > { %459 = vadd.xlane.f32.xlu1 %v458_v33  ;;  %462 = vadd.xlane.f32.xlu0 %v461_v48  ;;  %v464_v49 = vsel %vm334_vm0, %v1506_v37, 0.0 }
  0xd2   : > { %v1512_v50 = vpop.eup %1128 }
  0xd3   : > { %v1514_v51 = vpop.eup %1130  ;;  %v467_v52 = vsel %vm334_vm0, %v1512_v50, 0.0 }
  0xd4   : > { %465 = vadd.xlane.f32.xlu1 %v464_v49  ;;  %468 = vadd.xlane.f32.xlu0 %v467_v52  ;;  %v470_v53 = vsel %vm334_vm0, %v1514_v51, 0.0 }
  0xd6   : > { %v1520_v54 = vpop.eup %1132 }
  0xd7   : > { %v1522_v55 = vpop.eup %1134  ;;  %v473_v56 = vsel %vm334_vm0, %v1520_v54, 0.0 }
  0xd8   : > { %471 = vadd.xlane.f32.xlu1 %v470_v53  ;;  %474 = vadd.xlane.f32.xlu0 %v473_v56  ;;  %v476_v57 = vsel %vm334_vm0, %v1522_v55, 0.0 }
  0xdc   : > { %477 = vadd.xlane.f32.xlu1 %v476_v57 }
  0xed   : > { %641 = vrot.lane.b32.xlu1 %v639_v60, %s1254_s21  ;;  %s1176_s21 = sshll.u32 %s1259_s18, 4  ;;  %s1177_s21 = int_to_ptr.vmem [resolvable:$false] %s1176_s21 }
  0xee   : > { %326 = vperm.xlu0 %1098, %v1536_v61   ;;  %p1179_p1 = scmp.lt.s32.totalorder %s1602_s9, %s1177_s21 }
 0x149   : > { %v433_v0 = vpop.xlane.xlu0 %432 }
 0x14a   : > { %1136 = vrcp.f32 %v433_v0 }
 0x14d   : > { %v436_v1 = vpop.xlane.xlu1 %435  ;;  %v439_v3 = vpop.xlane.xlu0 %438 }
 0x14e   : > { %1138 = vrcp.f32 %v436_v1 }
 0x151   : > { %v442_v4 = vpop.xlane.xlu1 %441  ;;  %v445_v8 = vpop.xlane.xlu0 %444 }
 0x152   : > { %1140 = vrcp.f32 %v442_v4  ;;  %v323_v4 = vlaneseq }
 0x153   : > { %1142 = vrcp.f32 %v439_v3 }
 0x154   : > { %v1137_v6 = vpop.eup %1136 }
 0x155   : > { %v448_v5 = vpop.xlane.xlu1 %447  ;;  %v495_v11 = vmul.f32 %v1137_v6, %v1448_v63 }
 0x156   : > { %1144 = vrcp.f32 %v448_v5 }
 0x157   : > { %1146 = vrcp.f32 %v445_v8 }
 0x158   : > { %v1139_v7 = vpop.eup %1138 }
 0x159   : > { %v454_v10 = vpop.xlane.xlu1 %453  ;;  %v496_v13 = vmul.f32 %v1139_v7, %v1460_v9  ;;  %v451_v9 = vpop.xlane.xlu0 %450  ;;  %v324_v7 = vand.u32 127, %v323_v4 }
 0x15a   : > { %1148 = vrcp.f32 %v454_v10 }
 0x15b   : > { %v1005_v15 = vpack.c.bf16 %v496_v13, %v495_v11  ;;  %1150 = vrcp.f32 %v451_v9 }
 0x15c   : > { %v1141_v16 = vpop.eup %1140 }
 0x15d   : > { %v460_v17 = vpop.xlane.xlu1 %459  ;;  %1007 = vmatpush3.bf16.xpose.msk.msra.mxu0 %vm1544_vm2, %v1005_v15  ;;  %v1143_v18 = vpop.eup %1142  ;;  %v498_v63 = vmul.f32 %v1141_v16, %v1462_v12  ;;  %v663_v16 = vshrl.u32 %v323_v4, 7 }
 0x15e   : > { %1008 = vmatprep.subr.bf16.mxu0 %v1253_v58  ;;  %v497_v21 = vmul.f32 %v1143_v18, %v1450_v2  ;;  %v457_v29 = vpop.xlane.xlu0 %456  ;;  %1152 = vrcp.f32 %v460_v17 }
 0x15f   : > { %1154 = vrcp.f32 %v457_v29  ;;  %v673_v17 = vsub.s32 1, %v663_v16  ;;  %v664_v61 = vsub.s32 0, %v663_v16 }
 0x160   : > { %v1009_v24 = vpack.c.bf16 %v498_v63, %v497_v21  ;;  %v1145_v25 = vpop.eup %1144 }
 0x161   : > { %v466_v20 = vpop.xlane.xlu1 %465  ;;  %v1147_v23 = vpop.eup %1146  ;;  %v500_v27 = vmul.f32 %v1145_v25, %v1474_v22 }
 0x162   : > { %v499_v12 = vmul.f32 %v1147_v23, %v1472_v19  ;;  %v463_v42 = vpop.xlane.xlu0 %462  ;;  %1156 = vrcp.f32 %v466_v20 }
 0x163   : > { %1158 = vrcp.f32 %v463_v42 }
 0x164   : > { %v1013_v35 = vpack.c.bf16 %v500_v27, %v499_v12  ;;  %v1149_v2 = vpop.eup %1148 }
 0x165   : > { %v472_v26 = vpop.xlane.xlu1 %471  ;;  %1011 = vmatpush3.bf16.xpose.msk.msra.mxu0 %vm1544_vm2, %v1009_v24  ;;  %v1151_v41 = vpop.eup %1150  ;;  %v502_v32 = vmul.f32 %v1149_v2, %v1486_v38 }
 0x166   : > { %1012 = vmatprep.subr.bf16.mxu0 %v1253_v58  ;;  %v501_v44 = vmul.f32 %v1151_v41, %v1484_v30  ;;  %v469_v38 = vpop.xlane.xlu0 %468  ;;  %1160 = vrcp.f32 %v472_v26  ;;  %v1258_v30 = vmov 1  }
 0x167   : > { %1162 = vrcp.f32 %v469_v38 }
 0x168   : > { %v1017_v19 = vpack.c.bf16 %v502_v32, %v501_v44  ;;  %v1153_v45 = vpop.eup %1152 }
 0x169   : > { %v478_v34 = vpop.xlane.xlu1 %477  ;;  %v1155_v47 = vpop.eup %1154  ;;  %v504_v33 = vmul.f32 %v1153_v45, %v1498_v46 }
 0x16a   : > { %v503_v48 = vmul.f32 %v1155_v47, %v1496_v43  ;;  %v475_v56 = vpop.xlane.xlu0 %474  ;;  %1164 = vrcp.f32 %v478_v34 }
 0x16b   : > { %1166 = vrcp.f32 %v475_v56 }
 0x16c   : > { %v1021_v49 = vpack.c.bf16 %v504_v33, %v503_v48  ;;  %v1157_v52 = vpop.eup %1156 }
 0x16d   : > { %v642_v39 = vpop.permute.xlu1 %641  ;;  %1015 = vmatpush3.bf16.xpose.msk.msra.mxu0 %vm1544_vm2, %v1013_v35  ;;  %v1159_v53 = vpop.eup %1158  ;;  %v506_v46 = vmul.f32 %v1157_v52, %v1506_v37 }
 0x16e   : > { %v644_v31 = vsub.f32 %v322_v59, %v642_v39  ;;  %v645_v28 = vadd.f32 %v642_v39, %v322_v59  ;;  %1016 = vmatprep.subr.bf16.mxu0 %v1253_v58  ;;  %v505_v43 = vmul.f32 %v1159_v53, %v1504_v36  ;;  %v327_v8 = vpop.permute.xlu0 %326 }
 0x16f   : > { %vm328_vm3 = vcmp.eq.s32.totalorder %v324_v7, %v327_v8 }
 0x170   : > { %v651_v22 = vsub.f32 %v645_v28, %v644_v31  ;;  %v1025_v57 = vpack.c.bf16 %v506_v46, %v505_v43  ;;  %v1161_v59 = vpop.eup %1160 }
 0x171   : > { %v1163_v60 = vpop.eup %1162  ;;  %v508_v0 = vmul.f32 %v1161_v59, %v1514_v51 }
 0x172   : > { %653 = vrot.lane.b32.xlu1 %v651_v22, %s1257_s22  ;;  %v507_v37 = vmul.f32 %v1163_v60, %v1512_v50  ;;  %s1178_s22 = scalar_lea.vmem %s1177_s21, 256 }
 0x173   : > { %p1180_p2 = scmp.lt.s32.totalorder %s1178_s22, %s1172_s14 }
 0x174   : > { %v1029_v1 = vpack.c.bf16 %v508_v0, %v507_v37  ;;  %v1165_v36 = vpop.eup %1164 }
 0x175   : > { %1019 = vmatpush3.bf16.xpose.msk.msra.mxu0 %vm1544_vm2, %v1017_v19  ;;  %v1167_v3 = vpop.eup %1166  ;;  %v510_v5 = vmul.f32 %v1165_v36, %v1522_v55  ;;  %v890_v55 = vsel %vm331_vm4, 1.0, %v1256_v62  ;;  %p1181_p3 = por %p1180_p2, %p1179_p1 }
 0x176   : > { %659 = vperm.xlu1 %1099, %v644_v31   ;;  %1020 = vmatprep.subr.bf16.mxu0 %v1253_v58  ;;  %v509_v6 = vmul.f32 %v1167_v3, %v1520_v54 }
 0x177   : > { %p1182_p5 = pnand %p1181_p3, %p1175_p0 }
 0x178   : > { %v1033_v51 = vpack.c.bf16 %v510_v5, %v509_v6 }
 0x17a   : > { %1100 = vset.pattern.permute.xlu1 %v1258_v30 }
 0x17b   : > { %668 = vperm.xlu1 %1100, %v644_v31  }
 0x17d   : > { %1023 = vmatpush3.bf16.xpose.msk.msra.mxu0 %vm1544_vm2, %v1021_v49 }
 0x17e   : > { %1024 = vmatprep.subr.bf16.mxu0 %v1253_v58 }
 0x17f   : > { %1101 = vset.pattern.permute.xlu1 %v1252_v40 }
 0x180   : > { %678 = vperm.xlu1 %1101, %v645_v28  }
 0x184   : > { %1102 = vset.pattern.permute.xlu1 %v1258_v30 }
 0x185   : > { %687 = vperm.xlu1 %1102, %v645_v28   ;;  %1027 = vmatpush3.bf16.xpose.msk.msra.mxu0 %vm1544_vm2, %v1025_v57 }
 0x186   : > { %1028 = vmatprep.subr.bf16.mxu0 %v1253_v58 }
 0x189   : > { %1103 = vset.pattern.permute.xlu1 %v1252_v40  ;;  %v889_v40 = vsel %vm328_vm3, 1.0, %v1256_v62 }
 0x18d   : > { %1031 = vmatpush3.bf16.xpose.msk.msra.mxu0 %vm1544_vm2, %v1029_v1 }
 0x18e   : > { %1032 = vmatprep.subr.bf16.mxu0 %v1253_v58  ;;  %v320_v58 = vld [vmem:[%s279_s5] sm:$0xf] }
 0x18f   : > { %v633_v13 = vmul.f32 0.5, %v320_v58 }
 0x191   : > { %v635_v14 = vrot.slane %v633_v13, 2 }
 0x193   : > { %v637_v18 = vsub.f32 %v320_v58, %v635_v14  ;;  %v638_v63 = vadd.f32 %v635_v14, %v320_v58 }
 0x195   : > { %1035 = vmatpush3.bf16.xpose.msk.msra.mxu0 %vm1544_vm2, %v1033_v51  ;;  %v693_v9 = vrot.slane %v638_v63, %v673_v17  ;;  %v646_v20 = vsub.f32 %v638_v63, %v637_v18  ;;  %v674_v21 = vrot.slane %v637_v18, %v673_v17  ;;  %v684_v24 = vrot.slane %v638_v63, %v664_v61 }
 0x196   : > { %v665_v25 = vrot.slane %v637_v18, %v664_v61 }
 0x197   : > { %v648_v23 = vrot.slane %v646_v20, 1 }
 0x199   : > { %v650_v41 = vmul.f32 %v648_v23, %v646_v20 }
 0x19b   : > { %v703_v44 = vrot.slane %v650_v41, %v664_v61 }
 0x19c   : > { %1002 = vmatmul.mubr.msk.f32.vlgmr.msra.gmra.mrb[0].mxu0 %vm334_vm0, %v889_v40 }
 0x1e4   : > { %v654_v50 = vpop.permute.xlu1 %653 }
 0x1e5   : > { %v656_v10 = vmul.f32 %v654_v50, %v651_v22 }
 0x1e7   : > { %706 = vperm.xlu1 %1103, %v656_v10  }
 0x1eb   : > { %744 = vperm.xlu1 %1103, %v890_v55  }
 0x1f5   : > { %v660_v54 = vpop.permute.xlu1 %659 }
 0x1f6   : > { %v666_v2 = vmax.f32 %v660_v54, %v665_v25  ;;  %v714_v31 = vmin.f32 %v660_v54, %v665_v25  ;;  %v727_v53 = vsub.f32 %v665_v25, %v660_v54 }
 0x1f8   : > { %v728_v59 = vand.u32 2147483647, %v727_v53 }
 0x1fa   : > { %v669_v11 = vpop.permute.xlu1 %668 }
 0x1fb   : > { %v675_v29 = vmax.f32 %v669_v11, %v674_v21  ;;  %v715_v12 = vmin.f32 %v669_v11, %v674_v21  ;;  %v729_v49 = vsub.f32 %v674_v21, %v669_v11 }
 0x1fd   : > { %v730_v56 = vand.u32 2147483647, %v729_v49 }
 0x1ff   : > { %v679_v15 = vpop.permute.xlu1 %678  ;;  %v731_v37 = vadd.f32 %v730_v56, %v728_v59 }
 0x200   : > { %v685_v34 = vmin.f32 %v679_v15, %v684_v24  ;;  %v716_v35 = vmax.f32 %v679_v15, %v684_v24  ;;  %v732_v46 = vsub.f32 %v684_v24, %v679_v15 }
 0x202   : > { %v695_v32 = vsub.f32 %v685_v34, %v666_v2  ;;  %v718_v22 = vsub.f32 %v716_v35, %v714_v31  ;;  %v733_v60 = vand.u32 2147483647, %v732_v46 }
 0x204   : > { %v688_v62 = vpop.permute.xlu1 %687  ;;  %v696_v45 = vmax.f32 %v695_v32, 0.0  ;;  %v734_v36 = vadd.f32 %v733_v60, %v731_v37 }
 0x205   : > { %v694_v26 = vmin.f32 %v688_v62, %v693_v9  ;;  %v717_v27 = vmax.f32 %v688_v62, %v693_v9  ;;  %v735_v43 = vsub.f32 %v693_v9, %v688_v62 }
 0x207   : > { %v697_v39 = vsub.f32 %v694_v26, %v675_v29  ;;  %v719_v28 = vsub.f32 %v717_v27, %v715_v12  ;;  %v736_v1 = vand.u32 2147483647, %v735_v43 }
 0x209   : > { %v698_v42 = vmax.f32 %v697_v39, 0.0  ;;  %v720_v19 = vmul.f32 %v719_v28, %v718_v22  ;;  %v737_v5 = vadd.f32 %v736_v1, %v734_v36 }
 0x20b   : > { %v699_v33 = vmul.f32 %v698_v42, %v696_v45  ;;  %v722_v48 = vadd.f32 1e-07, %v720_v19  ;;  %v738_v40 = vmul.f32 0.25, %v737_v5 }
 0x20d   : > { %1168 = vrcp.f32 %v722_v48  ;;  %v740_v55 = vmul.f32 5.0, %v738_v40 }
 0x217   : > { %v1169_v4 = vpop.eup %1168 }
 0x266   : > { %v707_v47 = vpop.permute.xlu1 %706 }
 0x267   : > { %v709_v38 = vadd.f32 %v707_v47, %v703_v44 }
 0x269   : > { %v710_v30 = vsub.f32 %v709_v38, %v699_v33 }
 0x26a   : > { %v745_v11 = vpop.permute.xlu1 %744 }
 0x26b   : > { %v711_v52 = vadd.f32 1e-07, %v710_v30  ;;  %v721_v3 = vsub.f32 %v720_v19, %v710_v30 }
 0x26d   : > { %1170 = vrcp.f32 %v711_v52  ;;  %v724_v51 = vmul.f32 %v1169_v4, %v721_v3 }
 0x26f   : > { %v628_v57 = vpop.f32.mrb[0].mxu0 }
 0x270   : > { %v1003_v0 = vpop.f32.mrb[1].mxu0  ;;  %v632_v58 = vsub.f32 1.0, %v628_v57 }
 0x277   : > { %v1171_v6 = vpop.eup %1170 }
 0x278   : > { %v713_v7 = vmul.f32 %v1171_v6, %v699_v33 }
 0x27a   : > { %v725_v8 = vsub.f32 %v713_v7, %v724_v51 }
 0x27c   : > { %v726_v50 = vsub.f32 1.0, %v725_v8 }
 0x27e   : > { %v739_v10 = vmul.f32 2.0, %v726_v50 }
 0x280   : > { %v741_v54 = vadd.f32 %v740_v55, %v739_v10 }
 0x282   : > { %v747_v13 = vmul.f32 %v745_v11, %v741_v54 }
 0x284   : > { %v748_v14 = vadd.f32 %v747_v13, %v632_v58 }
 0x286   : > { %749 = vst [vmem:[%s262_s8] sm:$0xff] %v748_v14 }
 0x287   : > { %1185 = shalt.err (!%p1182_p5)
}
 0x288   : > { %s1186_s24 = scalar_lea.hbm %s1600_s12, 128  ;;  %s1190_s5 = scalar_lea.hbm %s1651_s4, 256 }
 0x289   : > { %p1187_p6 = scmp.ne.s32.totalorder %s1600_s12, %s1186_s24  ;;  %p1191_p10 = scmp.lt.u32.totalorder %s1600_s12, %s1651_s4 }
 0x28a   : > { %p1192_p11 = scmp.lt.u32.totalorder %s1190_s5, %s1186_s24  ;;  %p1194_p13 = scmp.lt.u32.totalorder %s1186_s24, %s1600_s12 }
 0x28b   : > { %p1188_p7 = pnand %p1187_p6, %p1325_p4 }
 0x28c   : > { %p1193_p12 = por %p1192_p11, %p1191_p10 }
 0x28d   : > { %p1189_p9 = pneg %p1188_p7 }
 0x28e   : > { %p1195_p0 = por %p1194_p13, %p1193_p12 }
 0x290   : > { %p1196_p1 = pnand %p1195_p0, %p1189_p9 }
 0x292   : > { %1199 = shalt.err (!%p1196_p1)
}
 0x293   : > { %1036 = dma.vmem_to_hbm [thread:$0]  (%p1325_p4), %s1602_s9, 128, %s1600_s12, %s751_s13  }
 0x294 PF: > { %p1042_p2 = scmp.ge.s32.totalorder %s1250_s20, 2  ;;  %s777_s7 = sand.u32 1, %s1230_s15  }
 0x295   : > { %s778_s8 = scalar_lea.sflag [#allocation3], %s777_s7 }
 0x296   : > { %p1039_p3 = pnand %p1042_p2, %p1332_p8 }
 0x298   : > { %1225 = dma.done.wait (!%p1039_p3), %s778_s8, 128  }
 0x299   : > { %1227 = vsyncadd (!%p1039_p3), %s778_s8, 4294967168  ;;  %s17_s20 = sadd.s32 1, %s1250_s20   ;;  %s1656_s15 = smov %s1234_s16 }
 0x29a   : > { %p14_p5 = scmp.ge.s32.totalorder %s17_s20, 4   ;;  %s1657_s16 = smov %s1238_s17 }
 0x29b   : > { %s1658_s17 = smov %s1338_s28  ;;  %s1659_s18 = smov %s1246_s19 }
 0x29c   : > { %s1660_s19 = smov %s1662_s23  ;;  %16 = sbr.rel (!%p14_p5) target bundleno = 4 (0x4), region = 80 }
 0x2a3   :  { %783 = vsyncpa [#allocation3], 1 }
 0x2a4   :  { %785 = vsyncpa [#allocation3 + $0x1], 1 }

</bundles_post_ra>
